<compile_context>
chip_gen: v7x
topology: tpu7x:2x2x1
jax: 0.10.0
libtpu: 0.0.40
codegen_flags: <defaults>
</compile_context>

<pallas_src>
import numpy as np
import jax
import jax.numpy as jnp
from jax.experimental import pallas as pl
from jax.experimental.pallas import tpu as pltpu


# ----------------------------------------------------------------------------
# Model configuration
# ----------------------------------------------------------------------------
LATENT_DIM = 128          # PyTorch default latent_dim=128 (lane dense)
INPUT_CHANNELS = 1        # PyTorch default
IN_HW = 16                # encoder input spatial size (16 x 16)
OUTPUT_SHAPE = (8, 8, 8)  # TODO(synk): reduced from the (64,64,64) default to keep example shapes small
T_DIM = 4                 # conditioning vector size   (unspecified in reference)
DEC_HIDDEN = 128          # decoder hidden width       (unspecified; chosen lane dense)
C1, C2 = 8, 16            # encoder conv channels      (unspecified in reference)
VOL = OUTPUT_SHAPE[0] * OUTPUT_SHAPE[1] * OUTPUT_SHAPE[2]


# ----------------------------------------------------------------------------
# Init-time helper: fold a strided conv into a dense matrix (pure layout work,
# done ONCE at parameter-init time — never on the forward path).
# ----------------------------------------------------------------------------
def conv_to_dense(w, b, H, W, stride=2, pad=1):
    """PyTorch conv (weight (OC,IC,k,k), NCHW activations) as a dense map on
    the NCHW-flattened input:  y_flat = x_flat @ M + bias,
    with y_flat flattened in (OC, OH, OW) order (matches torch .view)."""
    OC, IC, k, _ = w.shape
    OH = (H + 2 * pad - k) // stride + 1
    OW = (W + 2 * pad - k) // stride + 1
    M = np.zeros((IC * H * W, OC * OH * OW), np.float32)
    for oc in range(OC):
        for oh in range(OH):
            for ow in range(OW):
                col = (oc * OH + oh) * OW + ow
                for ic in range(IC):
                    for kh in range(k):
                        ih = oh * stride + kh - pad
                        if ih < 0 or ih >= H:
                            continue
                        for kw in range(k):
                            iw = ow * stride + kw - pad
                            if iw < 0 or iw >= W:
                                continue
                            row = (ic * H + ih) * W + iw
                            M[row, col] = w[oc, ic, kh, kw]
    bias = np.repeat(np.asarray(b, np.float32), OH * OW)
    return M, bias


# ----------------------------------------------------------------------------
# The fused dCVAE forward kernel (everything in one VMEM-resident block)
# ----------------------------------------------------------------------------
def _dcvae_kernel(x_ref, t_ref, eps_ref,
                  w1_ref, b1_ref, w2_ref, b2_ref, wh_ref, bh_ref,
                  wd1z_ref, wd1t_ref, bd1_ref, wd2_ref, bd2_ref,
                  recon_ref, lat_ref):
    f32 = jnp.float32

    # ---- Encoder: conv1 -> ReLU -> conv2 -> ReLU (convs folded to matmuls) --
    # Weights arrive as bf16 (half the HBM bytes), are upcast once on the VPU,
    # and all MXU accumulation stays f32.
    h1 = jnp.maximum(
        jnp.dot(x_ref[...], w1_ref[...].astype(f32), preferred_element_type=f32)
        + b1_ref[...], 0.0)
    h2 = jnp.maximum(
        jnp.dot(h1, w2_ref[...].astype(f32), preferred_element_type=f32)
        + b2_ref[...], 0.0)

    # ---- fc_mu and fc_logvar merged into one matmul: head = [mu | logvar] ---
    head = jnp.dot(h2, wh_ref[...].astype(f32), preferred_element_type=f32) + bh_ref[...]
    mu = head[:, :LATENT_DIM]
    logvar = head[:, LATENT_DIM:]

    # ---- reparameterize: z = mu + exp(0.5*logvar) * eps  (eps passed in) ----
    z = mu + jnp.exp(0.5 * logvar) * eps_ref[...]

    # ---- Decoder3D: cat([z, t]) -> fc(+ReLU) -> fc -> sigmoid ---------------
    # cat([z,t]) @ Wd1  ==  z @ Wd1[:L] + t @ Wd1[L:]   (weight split at init).
    # The t part has K=4, so it runs as 4 unrolled VPU broadcast MACs instead
    # of a padded MXU matmul.
    hd = jnp.dot(z, wd1z_ref[...].astype(f32), preferred_element_type=f32) + bd1_ref[...]
    wt = wd1t_ref[...].astype(f32)          # (T_DIM, DEC_HIDDEN)
    tv = t_ref[...]                         # (B, T_DIM) f32
    for j in range(T_DIM):                  # static unroll, T_DIM = 4
        hd = hd + tv[:, j:j + 1] * wt[j:j + 1, :]
    hd = jnp.maximum(hd, 0.0)

    vol = jax.nn.sigmoid(
        jnp.dot(hd, wd2_ref[...].astype(f32), preferred_element_type=f32) + bd2_ref[...])

    # ---- Lane-dense stores: recon (B, 512) and coalesced latents (B, 384) ---
    recon_ref[...] = vol
    lat_ref[...] = jnp.concatenate([head, z], axis=1)   # [mu | logvar | z]


_KERNEL_PARAM_KEYS = ("enc_w1", "enc_b1", "enc_w2", "enc_b2", "head_w", "head_b",
                      "dec_w1z", "dec_w1t", "dec_b1", "dec_w2", "dec_b2")


def dcvae_forward(params, x, t, key):
    """Full dCVAE forward: returns (reconstructed_volume, mu, logvar, z)."""
    B = x.shape[0]
    x_flat = x.reshape(B, -1)                      # NCHW flatten (metadata only)
    # eps ~ N(0,1): the analogue of torch.randn_like, drawn per-call from `key`.
    eps = jax.random.normal(key, (B, LATENT_DIM), jnp.float32)
    weights = [params[k] for k in _KERNEL_PARAM_KEYS]

    matmul_flops = 2 * B * sum(
        int(params[k].shape[0]) * int(params[k].shape[1])
        for k in ("enc_w1", "enc_w2", "head_w", "dec_w1z", "dec_w1t", "dec_w2"))
    out_bytes = 4 * B * (VOL + 3 * LATENT_DIM)
    in_bytes = sum(int(a.size) * a.dtype.itemsize
                   for a in [x_flat, t, eps] + weights)
    cost = pl.CostEstimate(flops=int(matmul_flops),
                           transcendentals=int(B * (LATENT_DIM + VOL)),
                           bytes_accessed=int(in_bytes + out_bytes))

    vmem = pl.BlockSpec(memory_space=pltpu.MemorySpace.VMEM)

    recon_flat, lat = pl.pallas_call(
        _dcvae_kernel,
        out_shape=(
            jax.ShapeDtypeStruct((B, VOL), jnp.float32),              # recon
            jax.ShapeDtypeStruct((B, 3 * LATENT_DIM), jnp.float32),   # mu|logvar|z
        ),
        in_specs=[vmem, vmem, vmem] + [vmem] * len(weights),
        out_specs=(vmem, vmem),
        cost_estimate=cost,
    )(x_flat, t, eps, *weights)

    mu = lat[:, :LATENT_DIM]
    logvar = lat[:, LATENT_DIM:2 * LATENT_DIM]
    z = lat[:, 2 * LATENT_DIM:]
    return recon_flat.reshape(B, *OUTPUT_SHAPE), mu, logvar, z


# ----------------------------------------------------------------------------
# Deterministic parameter init (conv layers folded to dense at init time).
# Conv / fc weights are bf16-rounded ONCE so the folded dense matrices cast to
# bf16 losslessly and the f32 reference uses numerically identical values.
# ----------------------------------------------------------------------------
def init_params(key):
    ks = jax.random.split(key, 6)

    def w(k_, shape, s):
        return (s * jax.random.normal(k_, shape)).astype(jnp.float32)

    def bf16_round(a):
        return a.astype(jnp.bfloat16).astype(jnp.float32)

    conv1_w = bf16_round(w(ks[0], (C1, INPUT_CHANNELS, 3, 3), 0.1))
    conv1_b = jnp.zeros((C1,), jnp.float32)
    conv2_w = bf16_round(w(ks[1], (C2, C1, 3, 3), 0.1))
    conv2_b = jnp.zeros((C2,), jnp.float32)

    h1_hw = IN_HW // 2                    # 8   (after conv1, stride 2)
    h2_hw = IN_HW // 4                    # 4   (after conv2, stride 2)
    flat = C2 * h2_hw * h2_hw             # 256 (matches PyTorch .view(B, -1))

    enc_w1, enc_b1 = conv_to_dense(np.asarray(conv1_w), np.asarray(conv1_b), IN_HW, IN_HW)
    enc_w2, enc_b2 = conv_to_dense(np.asarray(conv2_w), np.asarray(conv2_b), h1_hw, h1_hw)

    fc_mu_w = w(ks[2], (flat, LATENT_DIM), 0.05)
    fc_logvar_w = w(ks[3], (flat, LATENT_DIM), 0.05)
    head_w = bf16_round(jnp.concatenate([fc_mu_w, fc_logvar_w], axis=1))  # (flat, 2L)
    head_b = jnp.zeros((1, 2 * LATENT_DIM), jnp.float32)

    dec_w1 = w(ks[4], (LATENT_DIM + T_DIM, DEC_HIDDEN), 0.1)     # acts on cat(z, t)
    dec_b1 = jnp.zeros((1, DEC_HIDDEN), jnp.float32)
    dec_w2 = w(ks[5], (DEC_HIDDEN, VOL), 0.05)
    dec_b2 = jnp.zeros((1, VOL), jnp.float32)

    bf16 = jnp.bfloat16
    return {
        # kernel-ready parameters (weight matrices bf16, biases f32)
        "enc_w1": jnp.asarray(enc_w1).astype(bf16),
        "enc_b1": jnp.asarray(enc_b1).reshape(1, -1),
        "enc_w2": jnp.asarray(enc_w2).astype(bf16),
        "enc_b2": jnp.asarray(enc_b2).reshape(1, -1),
        "head_w": head_w.astype(bf16), "head_b": head_b,
        "dec_w1z": dec_w1[:LATENT_DIM].astype(bf16),
        "dec_w1t": dec_w1[LATENT_DIM:].astype(bf16),
        "dec_b1": dec_b1, "dec_w2": dec_w2.astype(bf16), "dec_b2": dec_b2,
        # bf16-rounded conv/head weights in f32, only for the reference check
        "conv1_w": conv1_w, "conv1_b": conv1_b,
        "conv2_w": conv2_w, "conv2_b": conv2_b,
    }


def reference_mu_logvar(params, x):
    """Plain-JAX reference for the deterministic encoder path, using the
    ORIGINAL (bf16-rounded) conv weights in full f32 precision — validates both
    the conv->dense fold and the kernel."""
    dn = ("NCHW", "OIHW", "NCHW")
    prec = jax.lax.Precision.HIGHEST
    h = jax.lax.conv_general_dilated(x, params["conv1_w"], (2, 2), ((1, 1), (1, 1)),
                                     dimension_numbers=dn, precision=prec)
    h = jnp.maximum(h + params["conv1_b"][None, :, None, None], 0.0)
    h = jax.lax.conv_general_dilated(h, params["conv2_w"], (2, 2), ((1, 1), (1, 1)),
                                     dimension_numbers=dn, precision=prec)
    h = jnp.maximum(h + params["conv2_b"][None, :, None, None], 0.0)
    hf = h.reshape(x.shape[0], -1)
    head = jnp.dot(hf, params["head_w"].astype(jnp.float32), precision=prec) + params["head_b"]
    return head[:, :LATENT_DIM], head[:, LATENT_DIM:]


# ----------------------------------------------------------------------------
if __name__ == "__main__":
    key = jax.random.PRNGKey(0)
    k_param, k_x, k_t, k_eps = jax.random.split(key, 4)

    params = init_params(k_param)

    B = 2
    x = jax.random.normal(k_x, (B, INPUT_CHANNELS, IN_HW, IN_HW), jnp.float32)  # NCHW
    t = jax.random.normal(k_t, (B, T_DIM), jnp.float32)

    fwd = jax.jit(dcvae_forward)
    recon, mu, logvar, z = fwd(params, x, t, k_eps)
    jax.block_until_ready((recon, mu, logvar, z))

    # Shape / sanity checks
    assert recon.shape == (B, *OUTPUT_SHAPE)
    assert mu.shape == (B, LATENT_DIM)
    assert logvar.shape == (B, LATENT_DIM)
    assert z.shape == (B, LATENT_DIM)
    assert bool(jnp.all(jnp.isfinite(recon))) and bool(jnp.all(jnp.isfinite(z)))
    assert bool(jnp.all((recon >= 0.0) & (recon <= 1.0)))        # sigmoid output

    # Numerical check of the deterministic encoder path vs. plain JAX
    # (same bf16-rounded weight values on both sides -> tight tolerance).
    mu_ref, logvar_ref = reference_mu_logvar(params, x)
    head_k = jnp.concatenate([mu, logvar], axis=-1)
    head_r = jnp.concatenate([mu_ref, logvar_ref], axis=-1)
    err = float(jnp.max(jnp.abs(head_k - head_r)))
    scale = float(jnp.max(jnp.abs(head_r)))
    assert err <= 1e-3 * scale + 1e-4, (err, scale)

    # Reparameterization check: z must equal mu + exp(0.5*logvar) * eps for the
    # same eps the wrapper drew from k_eps.
    eps = jax.random.normal(k_eps, (B, LATENT_DIM), jnp.float32)
    z_ref = mu + jnp.exp(0.5 * logvar) * eps
    zerr = float(jnp.max(jnp.abs(z - z_ref)))
    assert zerr <= 1e-4 * float(jnp.max(jnp.abs(z_ref))) + 1e-5, zerr

    print("KERNEL_OK")
</pallas_src>

<mosaic_0001>
module attributes {stable_mosaic.version = 11 : i64} {
  func.func @_dcvae_kernel(%arg0: memref<2x256xf32, #tpu.memory_space<vmem>>, %arg1: memref<2x4xf32, #tpu.memory_space<vmem>>, %arg2: memref<2x128xf32, #tpu.memory_space<vmem>>, %arg3: memref<256x512xbf16, #tpu.memory_space<vmem>>, %arg4: memref<1x512xf32, #tpu.memory_space<vmem>>, %arg5: memref<512x256xbf16, #tpu.memory_space<vmem>>, %arg6: memref<1x256xf32, #tpu.memory_space<vmem>>, %arg7: memref<256x256xbf16, #tpu.memory_space<vmem>>, %arg8: memref<1x256xf32, #tpu.memory_space<vmem>>, %arg9: memref<128x128xbf16, #tpu.memory_space<vmem>>, %arg10: memref<4x128xbf16, #tpu.memory_space<vmem>>, %arg11: memref<1x128xf32, #tpu.memory_space<vmem>>, %arg12: memref<128x512xbf16, #tpu.memory_space<vmem>>, %arg13: memref<1x512xf32, #tpu.memory_space<vmem>>, %arg14: memref<2x512xf32, #tpu.memory_space<vmem>>, %arg15: memref<2x384xf32, #tpu.memory_space<vmem>>) attributes {dimension_semantics = [], scalar_prefetch = 0 : i64, scratch_operands = 0 : i64, tpu.core_type = #tpu.core_type<tc>} {
    %c0 = arith.constant 0 : index
    %c0_0 = arith.constant 0 : index
    %0 = vector.load %arg0[%c0, %c0_0] : memref<2x256xf32, #tpu.memory_space<vmem>>, vector<2x256xf32>
    %c0_1 = arith.constant 0 : index
    %c0_2 = arith.constant 0 : index
    %1 = vector.load %arg3[%c0_1, %c0_2] : memref<256x512xbf16, #tpu.memory_space<vmem>>, vector<256x512xbf16>
    %2 = arith.extf %1 : vector<256x512xbf16> to vector<256x512xf32>
    %cst = arith.constant dense<0.000000e+00> : vector<2x512xf32>
    %3 = tpu.matmul %0, %2, %cst {dimension_numbers = #tpu.dot_dimension_numbers<[1], [0], [0], [1], [0, 0, 1, 1], [], []>} : vector<2x256xf32>, vector<256x512xf32>, vector<2x512xf32> -> vector<2x512xf32>
    %c0_3 = arith.constant 0 : index
    %c0_4 = arith.constant 0 : index
    %4 = vector.load %arg4[%c0_3, %c0_4] : memref<1x512xf32, #tpu.memory_space<vmem>>, vector<1x512xf32>
    %5 = vector.broadcast %4 : vector<1x512xf32> to vector<2x512xf32>
    %6 = arith.addf %3, %5 : vector<2x512xf32>
    %cst_5 = arith.constant 0.000000e+00 : f32
    %7 = vector.broadcast %cst_5 : f32 to vector<2x512xf32>
    %8 = arith.maximumf %6, %7 : vector<2x512xf32>
    %c0_6 = arith.constant 0 : index
    %c0_7 = arith.constant 0 : index
    %9 = vector.load %arg5[%c0_6, %c0_7] : memref<512x256xbf16, #tpu.memory_space<vmem>>, vector<512x256xbf16>
    %10 = arith.extf %9 : vector<512x256xbf16> to vector<512x256xf32>
    %cst_8 = arith.constant dense<0.000000e+00> : vector<2x256xf32>
    %11 = tpu.matmul %8, %10, %cst_8 {dimension_numbers = #tpu.dot_dimension_numbers<[1], [0], [0], [1], [0, 0, 1, 1], [], []>} : vector<2x512xf32>, vector<512x256xf32>, vector<2x256xf32> -> vector<2x256xf32>
    %c0_9 = arith.constant 0 : index
    %c0_10 = arith.constant 0 : index
    %12 = vector.load %arg6[%c0_9, %c0_10] : memref<1x256xf32, #tpu.memory_space<vmem>>, vector<1x256xf32>
    %13 = vector.broadcast %12 : vector<1x256xf32> to vector<2x256xf32>
    %14 = arith.addf %11, %13 : vector<2x256xf32>
    %cst_11 = arith.constant 0.000000e+00 : f32
    %15 = vector.broadcast %cst_11 : f32 to vector<2x256xf32>
    %16 = arith.maximumf %14, %15 : vector<2x256xf32>
    %c0_12 = arith.constant 0 : index
    %c0_13 = arith.constant 0 : index
    %17 = vector.load %arg7[%c0_12, %c0_13] : memref<256x256xbf16, #tpu.memory_space<vmem>>, vector<256x256xbf16>
    %18 = arith.extf %17 : vector<256x256xbf16> to vector<256x256xf32>
    %cst_14 = arith.constant dense<0.000000e+00> : vector<2x256xf32>
    %19 = tpu.matmul %16, %18, %cst_14 {dimension_numbers = #tpu.dot_dimension_numbers<[1], [0], [0], [1], [0, 0, 1, 1], [], []>} : vector<2x256xf32>, vector<256x256xf32>, vector<2x256xf32> -> vector<2x256xf32>
    %c0_15 = arith.constant 0 : index
    %c0_16 = arith.constant 0 : index
    %20 = vector.load %arg8[%c0_15, %c0_16] : memref<1x256xf32, #tpu.memory_space<vmem>>, vector<1x256xf32>
    %21 = vector.broadcast %20 : vector<1x256xf32> to vector<2x256xf32>
    %22 = arith.addf %19, %21 : vector<2x256xf32>
    %23 = vector.extract_strided_slice %22 {offsets = [0, 0], sizes = [2, 128], strides = [1, 1]} : vector<2x256xf32> to vector<2x128xf32>
    %24 = vector.extract_strided_slice %22 {offsets = [0, 128], sizes = [2, 128], strides = [1, 1]} : vector<2x256xf32> to vector<2x128xf32>
    %cst_17 = arith.constant 5.000000e-01 : f32
    %25 = vector.broadcast %cst_17 : f32 to vector<2x128xf32>
    %26 = arith.mulf %25, %24 : vector<2x128xf32>
    %27 = math.exp %26 : vector<2x128xf32>
    %c0_18 = arith.constant 0 : index
    %c0_19 = arith.constant 0 : index
    %28 = vector.load %arg2[%c0_18, %c0_19] : memref<2x128xf32, #tpu.memory_space<vmem>>, vector<2x128xf32>
    %29 = arith.mulf %27, %28 : vector<2x128xf32>
    %30 = arith.addf %23, %29 : vector<2x128xf32>
    %c0_20 = arith.constant 0 : index
    %c0_21 = arith.constant 0 : index
    %31 = vector.load %arg9[%c0_20, %c0_21] : memref<128x128xbf16, #tpu.memory_space<vmem>>, vector<128x128xbf16>
    %32 = arith.extf %31 : vector<128x128xbf16> to vector<128x128xf32>
    %cst_22 = arith.constant dense<0.000000e+00> : vector<2x128xf32>
    %33 = tpu.matmul %30, %32, %cst_22 {dimension_numbers = #tpu.dot_dimension_numbers<[1], [0], [0], [1], [0, 0, 1, 1], [], []>} : vector<2x128xf32>, vector<128x128xf32>, vector<2x128xf32> -> vector<2x128xf32>
    %c0_23 = arith.constant 0 : index
    %c0_24 = arith.constant 0 : index
    %34 = vector.load %arg11[%c0_23, %c0_24] : memref<1x128xf32, #tpu.memory_space<vmem>>, vector<1x128xf32>
    %35 = vector.broadcast %34 : vector<1x128xf32> to vector<2x128xf32>
    %36 = arith.addf %33, %35 : vector<2x128xf32>
    %c0_25 = arith.constant 0 : index
    %c0_26 = arith.constant 0 : index
    %37 = vector.load %arg10[%c0_25, %c0_26] : memref<4x128xbf16, #tpu.memory_space<vmem>>, vector<4x128xbf16>
    %38 = arith.extf %37 : vector<4x128xbf16> to vector<4x128xf32>
    %c0_27 = arith.constant 0 : index
    %c0_28 = arith.constant 0 : index
    %39 = vector.load %arg1[%c0_27, %c0_28] : memref<2x4xf32, #tpu.memory_space<vmem>>, vector<2x4xf32>
    %40 = vector.extract_strided_slice %39 {offsets = [0, 0], sizes = [2, 1], strides = [1, 1]} : vector<2x4xf32> to vector<2x1xf32>
    %41 = vector.extract_strided_slice %38 {offsets = [0, 0], sizes = [1, 128], strides = [1, 1]} : vector<4x128xf32> to vector<1x128xf32>
    %42 = vector.broadcast %40 : vector<2x1xf32> to vector<2x128xf32>
    %43 = vector.broadcast %41 : vector<1x128xf32> to vector<2x128xf32>
    %44 = arith.mulf %42, %43 : vector<2x128xf32>
    %45 = arith.addf %36, %44 : vector<2x128xf32>
    %46 = vector.extract_strided_slice %39 {offsets = [0, 1], sizes = [2, 1], strides = [1, 1]} : vector<2x4xf32> to vector<2x1xf32>
    %47 = vector.extract_strided_slice %38 {offsets = [1, 0], sizes = [1, 128], strides = [1, 1]} : vector<4x128xf32> to vector<1x128xf32>
    %48 = vector.broadcast %46 : vector<2x1xf32> to vector<2x128xf32>
    %49 = vector.broadcast %47 : vector<1x128xf32> to vector<2x128xf32>
    %50 = arith.mulf %48, %49 : vector<2x128xf32>
    %51 = arith.addf %45, %50 : vector<2x128xf32>
    %52 = vector.extract_strided_slice %39 {offsets = [0, 2], sizes = [2, 1], strides = [1, 1]} : vector<2x4xf32> to vector<2x1xf32>
    %53 = vector.extract_strided_slice %38 {offsets = [2, 0], sizes = [1, 128], strides = [1, 1]} : vector<4x128xf32> to vector<1x128xf32>
    %54 = vector.broadcast %52 : vector<2x1xf32> to vector<2x128xf32>
    %55 = vector.broadcast %53 : vector<1x128xf32> to vector<2x128xf32>
    %56 = arith.mulf %54, %55 : vector<2x128xf32>
    %57 = arith.addf %51, %56 : vector<2x128xf32>
    %58 = vector.extract_strided_slice %39 {offsets = [0, 3], sizes = [2, 1], strides = [1, 1]} : vector<2x4xf32> to vector<2x1xf32>
    %59 = vector.extract_strided_slice %38 {offsets = [3, 0], sizes = [1, 128], strides = [1, 1]} : vector<4x128xf32> to vector<1x128xf32>
    %60 = vector.broadcast %58 : vector<2x1xf32> to vector<2x128xf32>
    %61 = vector.broadcast %59 : vector<1x128xf32> to vector<2x128xf32>
    %62 = arith.mulf %60, %61 : vector<2x128xf32>
    %63 = arith.addf %57, %62 : vector<2x128xf32>
    %cst_29 = arith.constant 0.000000e+00 : f32
    %64 = vector.broadcast %cst_29 : f32 to vector<2x128xf32>
    %65 = arith.maximumf %63, %64 : vector<2x128xf32>
    %c0_30 = arith.constant 0 : index
    %c0_31 = arith.constant 0 : index
    %66 = vector.load %arg12[%c0_30, %c0_31] : memref<128x512xbf16, #tpu.memory_space<vmem>>, vector<128x512xbf16>
    %67 = arith.extf %66 : vector<128x512xbf16> to vector<128x512xf32>
    %cst_32 = arith.constant dense<0.000000e+00> : vector<2x512xf32>
    %68 = tpu.matmul %65, %67, %cst_32 {dimension_numbers = #tpu.dot_dimension_numbers<[1], [0], [0], [1], [0, 0, 1, 1], [], []>} : vector<2x128xf32>, vector<128x512xf32>, vector<2x512xf32> -> vector<2x512xf32>
    %c0_33 = arith.constant 0 : index
    %c0_34 = arith.constant 0 : index
    %69 = vector.load %arg13[%c0_33, %c0_34] : memref<1x512xf32, #tpu.memory_space<vmem>>, vector<1x512xf32>
    %70 = vector.broadcast %69 : vector<1x512xf32> to vector<2x512xf32>
    %71 = arith.addf %68, %70 : vector<2x512xf32>
    %72 = arith.negf %71 : vector<2x512xf32>
    %73 = math.exp %72 : vector<2x512xf32>
    %cst_35 = arith.constant 1.000000e+00 : f32
    %74 = vector.broadcast %cst_35 : f32 to vector<2x512xf32>
    %75 = arith.addf %74, %73 : vector<2x512xf32>
    %76 = arith.divf %74, %75 : vector<2x512xf32>
    %c0_36 = arith.constant 0 : index
    %c0_37 = arith.constant 0 : index
    %77 = vector.load %arg14[%c0_36, %c0_37] : memref<2x512xf32, #tpu.memory_space<vmem>>, vector<2x512xf32>
    tpu.vector_store %arg14[%c0_36, %c0_37], %76 {strides = array<i32>} : memref<2x512xf32, #tpu.memory_space<vmem>>, vector<2x512xf32>,
    %78 = tpu.concatenate %22, %30 in 1 : vector<2x256xf32>, vector<2x128xf32> -> vector<2x384xf32>
    %c0_38 = arith.constant 0 : index
    %c0_39 = arith.constant 0 : index
    %79 = vector.load %arg15[%c0_38, %c0_39] : memref<2x384xf32, #tpu.memory_space<vmem>>, vector<2x384xf32>
    tpu.vector_store %arg15[%c0_38, %c0_39], %78 {strides = array<i32>} : memref<2x384xf32, #tpu.memory_space<vmem>>, vector<2x384xf32>,
    return
  }
}

</mosaic_0001>

<bundles_post_ra>
// kernel: dcvae_forward.1
= control target key start
LH: loop header
LB: loop body
LE: loop exit
PB: predicated region body
PF: predicated region fallthrough
CT: control target
= control target key end

     0   :  { %21 = vsyncpa [#allocation3], 0  ;;  %s2896_s0 = inlined_call_operand.vmem [shape: f32[2,256], index: 0, kind: input, shape index: {}]   ;;  %s2897_s1 = inlined_call_operand.vmem [shape: f32[2,4], index: 1, kind: input, shape index: {}]   ;;  %s2898_s2 = inlined_call_operand.vmem [shape: f32[2,128], index: 2, kind: input, shape index: {}]   ;;  %s2899_s3 = inlined_call_operand.hbm [shape: bf16[256,512], index: 3, kind: input, shape index: {}]   ;;  %s2900_s4 = inlined_call_operand.vmem [shape: f32[1,512], index: 4, kind: input, shape index: {}]   ;;  %s2901_s5 = inlined_call_operand.hbm [shape: bf16[512,256], index: 5, kind: input, shape index: {}]   ;;  %s2902_s6 = inlined_call_operand.vmem [shape: f32[1,256], index: 6, kind: input, shape index: {}]   ;;  %s2903_s7 = inlined_call_operand.hbm [shape: bf16[256,256], index: 7, kind: input, shape index: {}]   ;;  %s2904_s8 = inlined_call_operand.vmem [shape: f32[1,256], index: 8, kind: input, shape index: {}]   ;;  %s2905_s9 = inlined_call_operand.vmem [shape: bf16[128,128], index: 9, kind: input, shape index: {}]   ;;  %s2906_s10 = inlined_call_operand.vmem [shape: bf16[4,128], index: 10, kind: input, shape index: {}]   ;;  %s2907_s11 = inlined_call_operand.vmem [shape: f32[1,128], index: 11, kind: input, shape index: {}]   ;;  %s2908_s12 = inlined_call_operand.hbm [shape: bf16[128,512], index: 12, kind: input, shape index: {}]   ;;  %s2909_s13 = inlined_call_operand.vmem [shape: f32[1,512], index: 13, kind: input, shape index: {}]   ;;  %s2910_s14 = inlined_call_operand.vmem [shape: f32[2,512], index: 14, kind: output, shape index: {0}]   ;;  %s2911_s15 = inlined_call_operand.vmem [shape: f32[2,384], index: 15, kind: output, shape index: {1}]  }
   0x1   :  { %22 = vsyncpa [#allocation5], 0 }
   0x2   :  { %23 = vsyncpa [#allocation8], 0  ;;  %s2624_s18 = smov [#allocation4]   ;;  %s2530_s22 = scalar_lea.hbm %s2901_s5, 8192 }
   0x3   :  { %s49_s19 = sshll.u32 %s2624_s18, 4  ;;  %p2531_p0 = scmp.ne.s32.totalorder %s2901_s5, %s2530_s22  ;;  %s50_s19 = int_to_ptr.vmem [resolvable:$true] %s49_s19 }
   0x4   :  { %p2534_p1 = scmp.lt.u32.totalorder %s2530_s22, %s2901_s5 }
   0x6   :  { %p2536_p2 = pnand %p2534_p1, %p2531_p0 }
   0x8   :  { %2539 = shalt.err (!%p2536_p2)
}
   0x9   :  { %s2540_s27 = scalar_lea.vmem %s50_s19, 8192  ;;  %p2545_p4 = scmp.lt.s32.totalorder %s50_s19, %s50_s19 }
   0xa   :  { %p2541_p3 = scmp.ne.s32.totalorder %s50_s19, %s2540_s27  ;;  %p2546_p5 = scmp.lt.s32.totalorder %s2540_s27, %s2540_s27 }
   0xc   :  { %p2547_p6 = por %p2546_p5, %p2545_p4 }
   0xe   :  { %p2548_p7 = pnand %p2547_p6, %p2541_p3 }
  0x10   :  { %2551 = shalt.err (!%p2548_p7)
}
  0x11   :  { %s2912_s28 = smov 128   ;;  %s2913_s29 = smov 8  }
  0x12   :  { %55 = dma.hbm_to_vmem [thread:$0]  %s2901_s5, 8192, %s50_s19, [#allocation5], %s2912_s28, %s2912_s28, %s2913_s29  }
  0x13   :  { %s2627_s17 = smov [#allocation2]   ;;  %s2552_s22 = scalar_lea.hbm %s2899_s3, 8192 }
  0x14   :  { %s35_s18 = sshll.u32 %s2627_s17, 4  ;;  %p2553_p8 = scmp.ne.s32.totalorder %s2899_s3, %s2552_s22  ;;  %s36_s18 = int_to_ptr.vmem [resolvable:$true] %s35_s18 }
  0x15   :  { %p2556_p9 = scmp.lt.u32.totalorder %s2552_s22, %s2899_s3 }
  0x17   :  { %p2558_p10 = pnand %p2556_p9, %p2553_p8 }
  0x19   :  { %2561 = shalt.err (!%p2558_p10)
}
  0x1a   :  { %s2562_s27 = scalar_lea.vmem %s36_s18, 8192  ;;  %p2567_p12 = scmp.lt.s32.totalorder %s36_s18, %s36_s18 }
  0x1b   :  { %p2563_p11 = scmp.ne.s32.totalorder %s36_s18, %s2562_s27  ;;  %p2568_p13 = scmp.lt.s32.totalorder %s2562_s27, %s2562_s27 }
  0x1d   :  { %p2569_p0 = por %p2568_p13, %p2567_p12 }
  0x1f   :  { %p2570_p1 = pnand %p2569_p0, %p2563_p11 }
  0x21   :  { %2573 = shalt.err (!%p2570_p1)
}
  0x22   :  { %s2628_s5 = smov 256   ;;  %s2629_s19 = smov 16  }
  0x23   :  { %41 = dma.hbm_to_vmem [thread:$0]  %s2899_s3, 8192, %s36_s18, [#allocation3], %s2628_s5, %s2628_s5, %s2629_s19  }
  0x24   :  { %s2630_s17 = smov [#allocation6]   ;;  %s2631_s21 = smov [#allocation7]  }
  0x25   :  { %s63_s20 = sshll.u32 %s2630_s17, 4  ;;  %s83_s22 = sshll.u32 %s2631_s21, 4  ;;  %s64_s20 = int_to_ptr.vmem [resolvable:$true] %s63_s20  ;;  %s2750_s22 = int_to_ptr.vmem [resolvable:$true] %s83_s22 }
  0x26   :  { %s2574_s25 = scalar_lea.hbm %s2903_s7, 4096 }
  0x27   :  { %p2575_p2 = scmp.ne.s32.totalorder %s2903_s7, %s2574_s25  ;;  %p2578_p3 = scmp.lt.u32.totalorder %s2574_s25, %s2903_s7 }
  0x29   :  { %p2580_p4 = pnand %p2578_p3, %p2575_p2 }
  0x2b   :  { %2583 = shalt.err (!%p2580_p4)
}
  0x2c   :  { %s2584_s3 = scalar_lea.vmem %s64_s20, 4096  ;;  %p2589_p6 = scmp.lt.s32.totalorder %s64_s20, %s64_s20 }
  0x2d   :  { %p2585_p5 = scmp.ne.s32.totalorder %s64_s20, %s2584_s3  ;;  %p2590_p7 = scmp.lt.s32.totalorder %s2584_s3, %s2584_s3 }
  0x2f   :  { %p2591_p8 = por %p2590_p7, %p2589_p6 }
  0x31   :  { %p2592_p9 = pnand %p2591_p8, %p2585_p5 }
  0x33   :  { %2595 = shalt.err (!%p2592_p9)
}
  0x34   :  { %s2914_s18 = smov 8   ;;  %s2915_s30 = smov 128  }
  0x35   :  { %69 = dma.hbm_to_vmem [thread:$0]  %s2903_s7, 4096, %s64_s20, [#allocation5], %s2915_s30, %s2915_s30, %s2914_s18  }
  0x36   :  { %s2596_s28 = scalar_lea.hbm %s2908_s12, 4096 }
  0x37   :  { %p2597_p10 = scmp.ne.s32.totalorder %s2908_s12, %s2596_s28  ;;  %p2600_p11 = scmp.lt.u32.totalorder %s2596_s28, %s2908_s12 }
  0x39   :  { %p2602_p12 = pnand %p2600_p11, %p2597_p10 }
  0x3b   :  { %2605 = shalt.err (!%p2602_p12)
}
  0x3c   :  { %s2606_s27 = scalar_lea.vmem %s2750_s22, 4096  ;;  %p2611_p0 = scmp.lt.s32.totalorder %s2750_s22, %s2750_s22 }
  0x3d   :  { %p2607_p13 = scmp.ne.s32.totalorder %s2750_s22, %s2606_s27  ;;  %p2612_p1 = scmp.lt.s32.totalorder %s2606_s27, %s2606_s27 }
  0x3f   :  { %p2613_p2 = por %p2612_p1, %p2611_p0 }
  0x41   :  { %p2614_p3 = pnand %p2613_p2, %p2607_p13 }
  0x43   :  { %2617 = shalt.err (!%p2614_p3)
}
  0x44   :  { %89 = dma.hbm_to_vmem [thread:$0]  %s2908_s12, 4096, %s2750_s22, [#allocation8], %s2628_s5, %s2628_s5, %s2629_s19  }
  0x45   :  { %2618 = dma.done.wait [#allocation3], 8192  }
  0x46   :  { %2619 = vsyncadd [#allocation3], 4294959104 }
  0x47   :  { %2620 = dma.done.wait [#allocation5], 12288  }
  0x48   :  { %2621 = vsyncadd [#allocation5], 4294955008 }
  0x49   :  { %2622 = dma.done.wait [#allocation8], 4096  }
  0x4a   :  { %2623 = vsyncadd [#allocation8], 4294963200  ;;  %v2224_v0 = vld [vmem:[#allocation2 + $0x4] ss:$16 sps:$4 sm:$0xff]   ;;  %v2226_v1 = vld [vmem:[#allocation2] ss:$16 sps:$4 sm:$0xff]  }
  0x4b   :  { %1600 = vmatprep.subr.bf16.mxu0 %v2224_v0  ;;  %v2227_v2 = vld [vmem:[#allocation2 + $0x24] ss:$16 sps:$4 sm:$0xff]   ;;  %v2229_v3 = vld [vmem:[#allocation2 + $0x20] ss:$16 sps:$4 sm:$0xff]   ;;  %v2272_v14 = vld [vmem:[#allocation2 + $0xc] ss:$16 sps:$4 sm:$0xff]  }
  0x4c   :  { %1602 = vmatpush1.bf16.msra.mxu0 %v2226_v1  ;;  %v2230_v4 = vld [vmem:[#allocation2 + $0x44] ss:$16 sps:$4 sm:$0xff]   ;;  %v2232_v5 = vld [vmem:[#allocation2 + $0x40] ss:$16 sps:$4 sm:$0xff]   ;;  %v2274_v17 = vld [vmem:[#allocation2 + $0x8] ss:$16 sps:$4 sm:$0xff]   ;;  %1664 = vmatprep.subr.bf16.mxu1 %v2272_v14 }
  0x4d   :  { %1604 = vmatprep.subr.bf16.mxu0 %v2227_v2  ;;  %v2233_v6 = vld [vmem:[#allocation2 + $0x64] ss:$16 sps:$4 sm:$0xff]   ;;  %v2235_v7 = vld [vmem:[#allocation2 + $0x60] ss:$16 sps:$4 sm:$0xff]   ;;  %v2275_v19 = vld [vmem:[#allocation2 + $0x2c] ss:$16 sps:$4 sm:$0xff]   ;;  %1666 = vmatpush1.bf16.msra.mxu1 %v2274_v17 }
  0x4e   :  { %v2236_v8 = vld [vmem:[#allocation2 + $0x84] ss:$16 sps:$4 sm:$0xff]   ;;  %v2238_v9 = vld [vmem:[#allocation2 + $0x80] ss:$16 sps:$4 sm:$0xff]   ;;  %v2277_v20 = vld [vmem:[#allocation2 + $0x28] ss:$16 sps:$4 sm:$0xff]   ;;  %1668 = vmatprep.subr.bf16.mxu1 %v2275_v19 }
  0x4f   :  { %v2239_v10 = vld [vmem:[#allocation2 + $0xa4] ss:$16 sps:$4 sm:$0xff]   ;;  %v2241_v11 = vld [vmem:[#allocation2 + $0xa0] ss:$16 sps:$4 sm:$0xff]   ;;  %v2278_v21 = vld [vmem:[#allocation2 + $0x4c] ss:$16 sps:$4 sm:$0xff]  }
  0x50   :  { %1606 = vmatpush1.bf16.msra.mxu0 %v2229_v3  ;;  %v2242_v12 = vld [vmem:[#allocation2 + $0xc4] ss:$16 sps:$4 sm:$0xff]   ;;  %v2244_v13 = vld [vmem:[#allocation2 + $0xc0] ss:$16 sps:$4 sm:$0xff]   ;;  %v2280_v24 = vld [vmem:[#allocation2 + $0x48] ss:$16 sps:$4 sm:$0xff]  }
  0x51   :  { %1608 = vmatprep.subr.bf16.mxu0 %v2230_v4  ;;  %v2790_v15 = vld.sshfl [vmem:[%s2896_s0] sm:$0x33 pattern:$0x76325410]  ;;  %v2245_v18 = vld [vmem:[#allocation2 + $0xe4] ss:$16 sps:$4 sm:$0xff]   ;;  %1670 = vmatpush1.bf16.msra.mxu1 %v2277_v20 }
  0x52   :  { %v327_v16 = vcombine.high %v2790_v15, %v2790_v15  ;;  %v2247_v22 = vld [vmem:[#allocation2 + $0xe0] ss:$16 sps:$4 sm:$0xff]   ;;  %v2248_v23 = vld [vmem:[#allocation2 + $0x104] ss:$16 sps:$4 sm:$0xff]   ;;  %1672 = vmatprep.subr.bf16.mxu1 %v2278_v21  ;;  %v2281_v25 = vld [vmem:[#allocation2 + $0x6c] ss:$16 sps:$4 sm:$0xff]  }
  0x53   :  { %v2250_v26 = vld [vmem:[#allocation2 + $0x100] ss:$16 sps:$4 sm:$0xff]   ;;  %v2251_v27 = vld [vmem:[#allocation2 + $0x124] ss:$16 sps:$4 sm:$0xff]   ;;  %v2283_v28 = vld [vmem:[#allocation2 + $0x68] ss:$16 sps:$4 sm:$0xff]  }
  0x54   :  { %1610 = vmatpush1.bf16.msra.mxu0 %v2232_v5  ;;  %394 = vmatprep.mubr.f32.mxu0 %v327_v16  ;;  %v2284_v29 = vld [vmem:[#allocation2 + $0x8c] ss:$16 sps:$4 sm:$0xff]   ;;  %v2253_v30 = vld [vmem:[#allocation2 + $0x120] ss:$16 sps:$4 sm:$0xff]   ;;  %v2254_v31 = vld [vmem:[#allocation2 + $0x144] ss:$16 sps:$4 sm:$0xff]  }
  0x55   :  { %1612 = vmatprep.subr.bf16.mxu0 %v2233_v6  ;;  %465 = vmatprep.mubr.f32.mxu1 %v327_v16  ;;  %v2286_v32 = vld [vmem:[#allocation2 + $0x88] ss:$16 sps:$4 sm:$0xff]   ;;  %v2287_v33 = vld [vmem:[#allocation2 + $0xac] ss:$16 sps:$4 sm:$0xff]   ;;  %v2256_v34 = vld [vmem:[#allocation2 + $0x140] ss:$16 sps:$4 sm:$0xff]  }
  0x56   :  { %1674 = vmatpush1.bf16.msra.mxu1 %v2280_v24  ;;  %v2257_v35 = vld [vmem:[#allocation2 + $0x164] ss:$16 sps:$4 sm:$0xff]   ;;  %v2289_v36 = vld [vmem:[#allocation2 + $0xa8] ss:$16 sps:$4 sm:$0xff]   ;;  %v2290_v37 = vld [vmem:[#allocation2 + $0xcc] ss:$16 sps:$4 sm:$0xff]  }
  0x57   :  { %1676 = vmatprep.subr.bf16.mxu1 %v2281_v25  ;;  %v2259_v38 = vld [vmem:[#allocation2 + $0x160] ss:$16 sps:$4 sm:$0xff]   ;;  %v2260_v39 = vld [vmem:[#allocation2 + $0x184] ss:$16 sps:$4 sm:$0xff]   ;;  %v2292_v40 = vld [vmem:[#allocation2 + $0xc8] ss:$16 sps:$4 sm:$0xff]  }
  0x58   :  { %1614 = vmatpush1.bf16.msra.mxu0 %v2235_v7  ;;  %v2293_v41 = vld [vmem:[#allocation2 + $0xec] ss:$16 sps:$4 sm:$0xff]   ;;  %v2262_v42 = vld [vmem:[#allocation2 + $0x180] ss:$16 sps:$4 sm:$0xff]   ;;  %v2263_v43 = vld [vmem:[#allocation2 + $0x1a4] ss:$16 sps:$4 sm:$0xff]  }
  0x59   :  { %1616 = vmatprep.subr.bf16.mxu0 %v2236_v8  ;;  %v2295_v44 = vld [vmem:[#allocation2 + $0xe8] ss:$16 sps:$4 sm:$0xff]   ;;  %v2296_v45 = vld [vmem:[#allocation2 + $0x10c] ss:$16 sps:$4 sm:$0xff]   ;;  %v2265_v46 = vld [vmem:[#allocation2 + $0x1a0] ss:$16 sps:$4 sm:$0xff]  }
  0x5a   :  { %1678 = vmatpush1.bf16.msra.mxu1 %v2283_v28  ;;  %v2266_v47 = vld [vmem:[#allocation2 + $0x1c4] ss:$16 sps:$4 sm:$0xff]   ;;  %v2298_v48 = vld [vmem:[#allocation2 + $0x108] ss:$16 sps:$4 sm:$0xff]   ;;  %v2299_v49 = vld [vmem:[#allocation2 + $0x12c] ss:$16 sps:$4 sm:$0xff]  }
  0x5b   :  { %1680 = vmatprep.subr.bf16.mxu1 %v2284_v29  ;;  %v2268_v50 = vld [vmem:[#allocation2 + $0x1c0] ss:$16 sps:$4 sm:$0xff]   ;;  %v2269_v51 = vld [vmem:[#allocation2 + $0x1e4] ss:$16 sps:$4 sm:$0xff]   ;;  %v2301_v52 = vld [vmem:[#allocation2 + $0x128] ss:$16 sps:$4 sm:$0xff]  }
  0x5c   :  { %1618 = vmatpush1.bf16.msra.mxu0 %v2238_v9  ;;  %v2302_v53 = vld [vmem:[#allocation2 + $0x14c] ss:$16 sps:$4 sm:$0xff]   ;;  %v2271_v54 = vld [vmem:[#allocation2 + $0x1e0] ss:$16 sps:$4 sm:$0xff]   ;;  %v2304_v56 = vld [vmem:[#allocation2 + $0x148] ss:$16 sps:$4 sm:$0xff]  }
  0x5d   :  { %1620 = vmatprep.subr.bf16.mxu0 %v2239_v10  ;;  %v2320_v55 = vld [vmem:[#allocation4 + $0x4] ss:$8 sps:$4 sm:$0xff]   ;;  %v2307_v58 = vld [vmem:[#allocation2 + $0x168] ss:$16 sps:$4 sm:$0xff]   ;;  %v2323_v60 = vld [vmem:[#allocation4 + $0x14] ss:$8 sps:$4 sm:$0xff]  }
  0x5e   :  { %1682 = vmatpush1.bf16.msra.mxu1 %v2286_v32  ;;  %v2305_v57 = vld [vmem:[#allocation2 + $0x16c] ss:$16 sps:$4 sm:$0xff]   ;;  %v2322_v59 = vld [vmem:[#allocation4] ss:$8 sps:$4 sm:$0xff]   ;;  %v2325_v62 = vld [vmem:[#allocation4 + $0x10] ss:$8 sps:$4 sm:$0xff]  }
  0x5f   :  { %1684 = vmatprep.subr.bf16.mxu1 %v2287_v33  ;;  %v2308_v61 = vld [vmem:[#allocation2 + $0x18c] ss:$16 sps:$4 sm:$0xff]   ;;  %v2310_v0 = vld [vmem:[#allocation2 + $0x188] ss:$16 sps:$4 sm:$0xff]   ;;  %vm2633_vm0 = vmmov 0  }
  0x60   :  { %1622 = vmatpush1.bf16.msra.mxu0 %v2241_v11  ;;  %v2326_v63 = vld [vmem:[#allocation4 + $0x24] ss:$8 sps:$4 sm:$0xff]   ;;  %v2328_v2 = vld [vmem:[#allocation4 + $0x20] ss:$8 sps:$4 sm:$0xff]   ;;  %v2329_v3 = vld [vmem:[#allocation4 + $0x34] ss:$8 sps:$4 sm:$0xff]  }
  0x61   :  { %1624 = vmatprep.subr.bf16.mxu0 %v2242_v12  ;;  %v2311_v1 = vld [vmem:[#allocation2 + $0x1ac] ss:$16 sps:$4 sm:$0xff]   ;;  %v2313_v4 = vld [vmem:[#allocation2 + $0x1a8] ss:$16 sps:$4 sm:$0xff]  }
  0x62   :  { %1686 = vmatpush1.bf16.msra.mxu1 %v2289_v36  ;;  %v2314_v5 = vld [vmem:[#allocation2 + $0x1cc] ss:$16 sps:$4 sm:$0xff]   ;;  %v2331_v6 = vld [vmem:[#allocation4 + $0x30] ss:$8 sps:$4 sm:$0xff]   ;;  %v2334_v10 = vld [vmem:[#allocation4 + $0x40] ss:$8 sps:$4 sm:$0xff]  }
  0x63   :  { %1688 = vmatprep.subr.bf16.mxu1 %v2290_v37  ;;  %v2332_v7 = vld [vmem:[#allocation4 + $0x44] ss:$8 sps:$4 sm:$0xff]   ;;  %v2316_v8 = vld [vmem:[#allocation2 + $0x1c8] ss:$16 sps:$4 sm:$0xff]   ;;  %v2335_v11 = vld [vmem:[#allocation4 + $0x54] ss:$8 sps:$4 sm:$0xff]  }
  0x64   :  { %1626 = vmatpush1.bf16.msra.mxu0 %v2244_v13  ;;  %v2317_v9 = vld [vmem:[#allocation2 + $0x1ec] ss:$16 sps:$4 sm:$0xff]   ;;  %v2319_v12 = vld [vmem:[#allocation2 + $0x1e8] ss:$16 sps:$4 sm:$0xff]  }
  0x65   :  { %1628 = vmatprep.subr.bf16.mxu0 %v2245_v18  ;;  %v2337_v13 = vld [vmem:[#allocation4 + $0x50] ss:$8 sps:$4 sm:$0xff]   ;;  %v2338_v14 = vld [vmem:[#allocation4 + $0x64] ss:$8 sps:$4 sm:$0xff]   ;;  %v2340_v16 = vld [vmem:[#allocation4 + $0x60] ss:$8 sps:$4 sm:$0xff]  }
  0x66   :  { %1690 = vmatpush1.bf16.msra.mxu1 %v2292_v40  ;;  %v2341_v17 = vld [vmem:[#allocation4 + $0x74] ss:$8 sps:$4 sm:$0xff]   ;;  %v2343_v18 = vld [vmem:[#allocation4 + $0x70] ss:$8 sps:$4 sm:$0xff]   ;;  %v2344_v19 = vld [vmem:[#allocation4 + $0x84] ss:$8 sps:$4 sm:$0xff]  }
  0x67   :  { %1692 = vmatprep.subr.bf16.mxu1 %v2293_v41  ;;  %v2346_v20 = vld [vmem:[#allocation4 + $0x80] ss:$8 sps:$4 sm:$0xff]   ;;  %v2347_v21 = vld [vmem:[#allocation4 + $0x94] ss:$8 sps:$4 sm:$0xff]   ;;  %v2361_v29 = vld [vmem:[#allocation4 + $0xd0] ss:$8 sps:$4 sm:$0xff]  }
  0x68   :  { %1630 = vmatpush1.bf16.msra.mxu0 %v2247_v22  ;;  %v2349_v22 = vld [vmem:[#allocation4 + $0x90] ss:$8 sps:$4 sm:$0xff]   ;;  %v2352_v24 = vld [vmem:[#allocation4 + $0xa0] ss:$8 sps:$4 sm:$0xff]   ;;  %v2353_v25 = vld [vmem:[#allocation4 + $0xb4] ss:$8 sps:$4 sm:$0xff]  }
  0x69   :  { %1632 = vmatprep.subr.bf16.mxu0 %v2248_v23  ;;  %v2350_v23 = vld [vmem:[#allocation4 + $0xa4] ss:$8 sps:$4 sm:$0xff]   ;;  %v2359_v28 = vld [vmem:[#allocation4 + $0xd4] ss:$8 sps:$4 sm:$0xff]   ;;  %v2367_v33 = vld [vmem:[#allocation4 + $0xf0] ss:$8 sps:$4 sm:$0xff]  }
  0x6a   :  { %1694 = vmatpush1.bf16.msra.mxu1 %v2295_v44  ;;  %v2365_v32 = vld [vmem:[#allocation4 + $0xf4] ss:$8 sps:$4 sm:$0xff]   ;;  %v2418_v36 = vld [vmem:[#allocation6] ss:$8 sps:$4 sm:$0xff]  }
  0x6b   :  { %1696 = vmatprep.subr.bf16.mxu1 %v2296_v45  ;;  %v2419_v37 = vld [vmem:[#allocation6 + $0x14] ss:$8 sps:$4 sm:$0xff]   ;;  %v2424_v40 = vld [vmem:[#allocation6 + $0x20] ss:$8 sps:$4 sm:$0xff]  }
  0x6c   :  { %1634 = vmatpush1.bf16.msra.mxu0 %v2250_v26  ;;  %v2355_v26 = vld [vmem:[#allocation4 + $0xb0] ss:$8 sps:$4 sm:$0xff]   ;;  %v2425_v41 = vld [vmem:[#allocation6 + $0x34] ss:$8 sps:$4 sm:$0xff]   ;;  %v2430_v44 = vld [vmem:[#allocation6 + $0x40] ss:$8 sps:$4 sm:$0xff]  }
  0x6d   :  { %1636 = vmatprep.subr.bf16.mxu0 %v2251_v27  ;;  %v2358_v27 = vld [vmem:[#allocation4 + $0xc0] ss:$8 sps:$4 sm:$0xff]   ;;  %v2431_v45 = vld [vmem:[#allocation6 + $0x54] ss:$8 sps:$4 sm:$0xff]  }
  0x6e   :  { %1698 = vmatpush1.bf16.msra.mxu1 %v2298_v48  ;;  %v2436_v48 = vld [vmem:[#allocation6 + $0x60] ss:$8 sps:$4 sm:$0xff]  }
  0x6f   :  { %1700 = vmatprep.subr.bf16.mxu1 %v2299_v49  ;;  %v2437_v49 = vld [vmem:[#allocation6 + $0x74] ss:$8 sps:$4 sm:$0xff]  }
  0x70   :  { %1638 = vmatpush1.bf16.msra.mxu0 %v2253_v30  ;;  %v2362_v30 = vld [vmem:[#allocation4 + $0xe4] ss:$8 sps:$4 sm:$0xff]  }
  0x71   :  { %1640 = vmatprep.subr.bf16.mxu0 %v2254_v31  ;;  %v2364_v31 = vld [vmem:[#allocation4 + $0xe0] ss:$8 sps:$4 sm:$0xff]  }
  0x72   :  { %1702 = vmatpush1.bf16.msra.mxu1 %v2301_v52  ;;  %v2442_v52 = vld [vmem:[#allocation6 + $0x80] ss:$8 sps:$4 sm:$0xff]  }
  0x73   :  { %1704 = vmatprep.subr.bf16.mxu1 %v2302_v53  ;;  %v2443_v53 = vld [vmem:[#allocation6 + $0x94] ss:$8 sps:$4 sm:$0xff]  }
  0x74   :  { %1642 = vmatpush1.bf16.msra.mxu0 %v2256_v34  ;;  %v2368_v34 = vld [vmem:[#allocation4 + $0x104] ss:$8 sps:$4 sm:$0xff]  }
  0x75   :  { %1644 = vmatprep.subr.bf16.mxu0 %v2257_v35  ;;  %v2416_v35 = vld [vmem:[#allocation6 + $0x4] ss:$8 sps:$4 sm:$0xff]  }
  0x76   :  { %1706 = vmatpush1.bf16.msra.mxu1 %v2304_v56  ;;  %v2448_v56 = vld [vmem:[#allocation6 + $0xa0] ss:$8 sps:$4 sm:$0xff]  }
  0x77   :  { %1708 = vmatprep.subr.bf16.mxu1 %v2305_v57  ;;  %v2449_v57 = vld [vmem:[#allocation6 + $0xb4] ss:$8 sps:$4 sm:$0xff]  }
  0x78   :  { %1646 = vmatpush1.bf16.msra.mxu0 %v2259_v38  ;;  %v2421_v38 = vld [vmem:[#allocation6 + $0x10] ss:$8 sps:$4 sm:$0xff]  }
  0x79   :  { %1648 = vmatprep.subr.bf16.mxu0 %v2260_v39  ;;  %v2422_v39 = vld [vmem:[#allocation6 + $0x24] ss:$8 sps:$4 sm:$0xff]  }
  0x7a   :  { %1710 = vmatpush1.bf16.msra.mxu1 %v2307_v58  ;;  %v299_v58 = vlaneseq }
  0x7b   :  { %1712 = vmatprep.subr.bf16.mxu1 %v2308_v61 }
  0x7c   :  { %1650 = vmatpush1.bf16.msra.mxu0 %v2262_v42  ;;  %v2427_v42 = vld [vmem:[#allocation6 + $0x30] ss:$8 sps:$4 sm:$0xff]   ;;  %v2796_v61 = vshrl.u32 %v299_v58, 7  ;;  %v668_v58 = vld [vmem:[%s2902_s6] sm:$0x3] }
  0x7d   :  { %1652 = vmatprep.subr.bf16.mxu0 %v2263_v43  ;;  %v2428_v43 = vld [vmem:[#allocation6 + $0x44] ss:$8 sps:$4 sm:$0xff]  }
  0x7e   :  { %1714 = vmatpush1.bf16.msra.mxu1 %v2310_v0  ;;  %v2799_v0 = vsub.s32 0, %v2796_v61 }
  0x7f   :  { %1716 = vmatprep.subr.bf16.mxu1 %v2311_v1  ;;  %v2804_v1 = vld [vmem:[%s2900_s4] sm:$0xf] }
  0x80   :  { %1654 = vmatpush1.bf16.msra.mxu0 %v2265_v46  ;;  %v2433_v46 = vld [vmem:[#allocation6 + $0x50] ss:$8 sps:$4 sm:$0xff]  }
  0x81   :  { %1656 = vmatprep.subr.bf16.mxu0 %v2266_v47  ;;  %v2434_v47 = vld [vmem:[#allocation6 + $0x64] ss:$8 sps:$4 sm:$0xff]  }
  0x82   :  { %1718 = vmatpush1.bf16.msra.mxu1 %v2313_v4  ;;  %v2458_v4 = vld [vmem:[#allocation6 + $0xe4] ss:$8 sps:$4 sm:$0xff]  }
  0x83   :  { %1720 = vmatprep.subr.bf16.mxu1 %v2314_v5  ;;  %v302_v5 = vrot.slane %v2804_v1, %v2799_v0 }
  0x84   :  { %1658 = vmatpush1.bf16.msra.mxu0 %v2268_v50  ;;  %v2439_v50 = vld [vmem:[#allocation6 + $0x70] ss:$8 sps:$4 sm:$0xff]  }
  0x85   :  { %1660 = vmatprep.subr.bf16.mxu0 %v2269_v51  ;;  %v2440_v51 = vld [vmem:[#allocation6 + $0x84] ss:$8 sps:$4 sm:$0xff]  }
  0x86   :  { %1722 = vmatpush1.bf16.msra.mxu1 %v2316_v8 }
  0x87   :  { %1724 = vmatprep.subr.bf16.mxu1 %v2317_v9 }
  0x88   :  { %1662 = vmatpush1.bf16.msra.mxu0 %v2271_v54  ;;  %v2445_v54 = vld [vmem:[#allocation6 + $0x90] ss:$8 sps:$4 sm:$0xff]  }
  0x89   :  { %1728 = vmatprep.subr.bf16.mxu0 %v2320_v55  ;;  %v2446_v55 = vld [vmem:[#allocation6 + $0xa4] ss:$8 sps:$4 sm:$0xff]  }
  0x8a   :  { %1726 = vmatpush1.bf16.msra.mxu1 %v2319_v12 }
  0x8b   :  { %395 = vmatmul.mubr.f32.vlgmr.msra.gmra.mrb[0].mxu0 %v2790_v15  ;;  %1856 = vmatprep.subr.bf16.mxu1 %v2416_v35  ;;  %v2392_v35 = vld [vmem:[#allocation4 + $0x184] ss:$8 sps:$4 sm:$0xff]  }
  0x8c   :  { %1730 = vmatpush1.bf16.msra.mxu0 %v2322_v59  ;;  %v2451_v59 = vld [vmem:[#allocation6 + $0xb0] ss:$8 sps:$4 sm:$0xff]  }
  0x8d   :  { %1732 = vmatprep.subr.bf16.mxu0 %v2323_v60  ;;  %466 = vmatmul.mubr.f32.vlgmr.msra.gmra.mrb[0].mxu1 %v2790_v15  ;;  %v2356_v15 = vld [vmem:[#allocation4 + $0xc4] ss:$8 sps:$4 sm:$0xff]  }
  0x8e   :  { %1858 = vmatpush1.bf16.msra.mxu1 %v2418_v36  ;;  %v2452_v60 = vld [vmem:[#allocation6 + $0xc4] ss:$8 sps:$4 sm:$0xff]   ;;  %v2394_v36 = vld [vmem:[#allocation4 + $0x180] ss:$8 sps:$4 sm:$0xff]  }
  0x8f   :  { %1860 = vmatprep.subr.bf16.mxu1 %v2419_v37  ;;  %v2395_v37 = vld [vmem:[#allocation4 + $0x194] ss:$8 sps:$4 sm:$0xff]  }
  0x90   :  { %1734 = vmatpush1.bf16.msra.mxu0 %v2325_v62  ;;  %v2454_v62 = vld [vmem:[#allocation6 + $0xc0] ss:$8 sps:$4 sm:$0xff]  }
  0x91   :  { %1736 = vmatprep.subr.bf16.mxu0 %v2326_v63  ;;  %v2455_v63 = vld [vmem:[#allocation6 + $0xd4] ss:$8 sps:$4 sm:$0xff]  }
  0x92   :  { %1862 = vmatpush1.bf16.msra.mxu1 %v2421_v38  ;;  %v2397_v38 = vld [vmem:[#allocation4 + $0x190] ss:$8 sps:$4 sm:$0xff]  }
  0x93   :  { %1864 = vmatprep.subr.bf16.mxu1 %v2422_v39  ;;  %v2398_v39 = vld [vmem:[#allocation4 + $0x1a4] ss:$8 sps:$4 sm:$0xff]  }
  0x94   :  { %1738 = vmatpush1.bf16.msra.mxu0 %v2328_v2  ;;  %v2807_v2 = vsub.s32 1, %v2796_v61 }
  0x95   :  { %1740 = vmatprep.subr.bf16.mxu0 %v2329_v3  ;;  %v2457_v3 = vld [vmem:[#allocation6 + $0xd0] ss:$8 sps:$4 sm:$0xff]  }
  0x96   :  { %1866 = vmatpush1.bf16.msra.mxu1 %v2424_v40  ;;  %v2400_v40 = vld [vmem:[#allocation4 + $0x1a0] ss:$8 sps:$4 sm:$0xff]  }
  0x97   :  { %1868 = vmatprep.subr.bf16.mxu1 %v2425_v41  ;;  %v2401_v41 = vld [vmem:[#allocation4 + $0x1b4] ss:$8 sps:$4 sm:$0xff]  }
  0x98   :  { %1742 = vmatpush1.bf16.msra.mxu0 %v2331_v6  ;;  %v306_v6 = vrot.slane %v2804_v1, %v2807_v2 }
  0x99   :  { %1744 = vmatprep.subr.bf16.mxu0 %v2332_v7  ;;  %v2460_v7 = vld [vmem:[#allocation6 + $0xe0] ss:$8 sps:$4 sm:$0xff]  }
  0x9a   :  { %1870 = vmatpush1.bf16.msra.mxu1 %v2427_v42  ;;  %v2403_v42 = vld [vmem:[#allocation4 + $0x1b0] ss:$8 sps:$4 sm:$0xff]  }
  0x9b   :  { %1872 = vmatprep.subr.bf16.mxu1 %v2428_v43  ;;  %v2404_v43 = vld [vmem:[#allocation4 + $0x1c4] ss:$8 sps:$4 sm:$0xff]  }
  0x9c   :  { %1746 = vmatpush1.bf16.msra.mxu0 %v2334_v10 }
  0x9d   :  { %1748 = vmatprep.subr.bf16.mxu0 %v2335_v11 }
  0x9e   :  { %1874 = vmatpush1.bf16.msra.mxu1 %v2430_v44  ;;  %v2406_v44 = vld [vmem:[#allocation4 + $0x1c0] ss:$8 sps:$4 sm:$0xff]  }
  0x9f   :  { %1876 = vmatprep.subr.bf16.mxu1 %v2431_v45  ;;  %v2407_v45 = vld [vmem:[#allocation4 + $0x1d4] ss:$8 sps:$4 sm:$0xff]  }
  0xa0   :  { %1750 = vmatpush1.bf16.msra.mxu0 %v2337_v13  ;;  %v2370_v13 = vld [vmem:[#allocation4 + $0x100] ss:$8 sps:$4 sm:$0xff]  }
  0xa1   :  { %1752 = vmatprep.subr.bf16.mxu0 %v2338_v14 }
  0xa2   :  { %1878 = vmatpush1.bf16.msra.mxu1 %v2433_v46  ;;  %v2409_v46 = vld [vmem:[#allocation4 + $0x1d0] ss:$8 sps:$4 sm:$0xff]  }
  0xa3   :  { %1880 = vmatprep.subr.bf16.mxu1 %v2434_v47  ;;  %v2819_v47 = vsub.s32 2, %v2796_v61 }
  0xa4   :  { %1754 = vmatpush1.bf16.msra.mxu0 %v2340_v16  ;;  %v2371_v16 = vld [vmem:[#allocation4 + $0x114] ss:$8 sps:$4 sm:$0xff]  }
  0xa5   :  { %1756 = vmatprep.subr.bf16.mxu0 %v2341_v17  ;;  %v2373_v17 = vld [vmem:[#allocation4 + $0x110] ss:$8 sps:$4 sm:$0xff]  }
  0xa6   :  { %1882 = vmatpush1.bf16.msra.mxu1 %v2436_v48  ;;  %v2410_v48 = vld [vmem:[#allocation4 + $0x1e4] ss:$8 sps:$4 sm:$0xff]  }
  0xa7   :  { %1884 = vmatprep.subr.bf16.mxu1 %v2437_v49  ;;  %v2412_v49 = vld [vmem:[#allocation4 + $0x1e0] ss:$8 sps:$4 sm:$0xff]  }
  0xa8   :  { %1758 = vmatpush1.bf16.msra.mxu0 %v2343_v18  ;;  %v2374_v18 = vld [vmem:[#allocation4 + $0x124] ss:$8 sps:$4 sm:$0xff]  }
  0xa9   :  { %1760 = vmatprep.subr.bf16.mxu0 %v2344_v19  ;;  %v2376_v19 = vld [vmem:[#allocation4 + $0x120] ss:$8 sps:$4 sm:$0xff]  }
  0xaa   :  { %1886 = vmatpush1.bf16.msra.mxu1 %v2439_v50  ;;  %v310_v50 = vrot.slane %v2804_v1, %v2819_v47 }
  0xab   :  { %1888 = vmatprep.subr.bf16.mxu1 %v2440_v51  ;;  %v2413_v51 = vld [vmem:[#allocation4 + $0x1f4] ss:$8 sps:$4 sm:$0xff]  }
  0xac   :  { %1762 = vmatpush1.bf16.msra.mxu0 %v2346_v20  ;;  %v2377_v20 = vld [vmem:[#allocation4 + $0x134] ss:$8 sps:$4 sm:$0xff]  }
  0xad   :  { %1764 = vmatprep.subr.bf16.mxu0 %v2347_v21  ;;  %v2379_v21 = vld [vmem:[#allocation4 + $0x130] ss:$8 sps:$4 sm:$0xff]  }
  0xae   :  { %1890 = vmatpush1.bf16.msra.mxu1 %v2442_v52  ;;  %v2415_v52 = vld [vmem:[#allocation4 + $0x1f0] ss:$8 sps:$4 sm:$0xff]  }
  0xaf   :  { %1892 = vmatprep.subr.bf16.mxu1 %v2443_v53 }
  0xb0   :  { %1766 = vmatpush1.bf16.msra.mxu0 %v2349_v22  ;;  %v2814_v22 = vsub.s32 3, %v2796_v61 }
  0xb1   :  { %1768 = vmatprep.subr.bf16.mxu0 %v2350_v23  ;;  %v2380_v23 = vld [vmem:[#allocation4 + $0x144] ss:$8 sps:$4 sm:$0xff]  }
  0xb2   :  { %1894 = vmatpush1.bf16.msra.mxu1 %v2445_v54 }
  0xb3   :  { %1896 = vmatprep.subr.bf16.mxu1 %v2446_v55  ;;  %v2461_v55 = vld [vmem:[#allocation6 + $0xf4] ss:$8 sps:$4 sm:$0xff]  }
  0xb4   :  { %1770 = vmatpush1.bf16.msra.mxu0 %v2352_v24  ;;  %v2382_v24 = vld [vmem:[#allocation4 + $0x140] ss:$8 sps:$4 sm:$0xff]  }
  0xb5   :  { %1772 = vmatprep.subr.bf16.mxu0 %v2353_v25  ;;  %v314_v25 = vrot.slane %v2804_v1, %v2814_v22 }
  0xb6   :  { %1898 = vmatpush1.bf16.msra.mxu1 %v2448_v56  ;;  %v2463_v56 = vld [vmem:[#allocation6 + $0xf0] ss:$8 sps:$4 sm:$0xff]  }
  0xb7   :  { %1900 = vmatprep.subr.bf16.mxu1 %v2449_v57  ;;  %v2632_v57 = vmov 0.0|0.0  }
  0xb8   :  { %1774 = vmatpush1.bf16.msra.mxu0 %v2355_v26  ;;  %v2383_v26 = vld [vmem:[#allocation4 + $0x154] ss:$8 sps:$4 sm:$0xff]  }
  0xb9   :  { %1776 = vmatprep.subr.bf16.mxu0 %v2356_v15 }
  0xba   :  { %1902 = vmatpush1.bf16.msra.mxu1 %v2451_v59  ;;  %v673_v59 = vrot.slane %v668_v58, %v2799_v0 }
  0xbb   :  { %1904 = vmatprep.subr.bf16.mxu1 %v2452_v60  ;;  %v677_v60 = vrot.slane %v668_v58, %v2807_v2  ;;  %v2482_v58 = vld [vmem:[#allocation7 + $0x64] ss:$16 sps:$4 sm:$0xff]  }
  0xbc   :  { %1778 = vmatpush1.bf16.msra.mxu0 %v2358_v27 }
  0xbd   :  { %1780 = vmatprep.subr.bf16.mxu0 %v2359_v28  ;;  %v2385_v28 = vld [vmem:[#allocation4 + $0x150] ss:$8 sps:$4 sm:$0xff]  }
  0xbe   :  { %1906 = vmatpush1.bf16.msra.mxu1 %v2454_v62 }
  0xbf   :  { %1908 = vmatprep.subr.bf16.mxu1 %v2455_v63 }
  0xc0   :  { %1782 = vmatpush1.bf16.msra.mxu0 %v2361_v29 }
  0xc1   :  { %1784 = vmatprep.subr.bf16.mxu0 %v2362_v30  ;;  %v2386_v30 = vld [vmem:[#allocation4 + $0x164] ss:$8 sps:$4 sm:$0xff]  }
  0xc2   :  { %1910 = vmatpush1.bf16.msra.mxu1 %v2457_v3 }
  0xc3   :  { %1912 = vmatprep.subr.bf16.mxu1 %v2458_v4 }
  0xc4   :  { %1786 = vmatpush1.bf16.msra.mxu0 %v2364_v31 }
  0xc5   :  { %1788 = vmatprep.subr.bf16.mxu0 %v2365_v32  ;;  %v2388_v32 = vld [vmem:[#allocation4 + $0x160] ss:$8 sps:$4 sm:$0xff]  }
  0xc6   :  { %1914 = vmatpush1.bf16.msra.mxu1 %v2460_v7  ;;  %v1540_v7 = vld [vmem:[%s2905_s9 + $0x8] sm:$0xff]  }
  0xc7   :  { %1916 = vmatprep.subr.bf16.mxu1 %v2461_v55  ;;  %v2472_v55 = vld [vmem:[#allocation7 + $0x20] ss:$16 sps:$4 sm:$0xff]  }
  0xc8   :  { %1790 = vmatpush1.bf16.msra.mxu0 %v2367_v33  ;;  %v2389_v33 = vld [vmem:[#allocation4 + $0x174] ss:$8 sps:$4 sm:$0xff]  }
  0xc9   :  { %1792 = vmatprep.subr.bf16.mxu0 %v2368_v34  ;;  %v2391_v34 = vld [vmem:[#allocation4 + $0x170] ss:$8 sps:$4 sm:$0xff]  }
  0xca   :  { %1918 = vmatpush1.bf16.msra.mxu1 %v2463_v56 }
  0xcb   :  { %1919 = vmatprep.subr.bf16.mxu1 %v2632_v57 }
 0x15e   :  { %v396_v8 = vpop.f32.mrb[0].mxu0 }
 0x15f   :  { %v397_v9 = vadd.f32 %v396_v8, %v302_v5  ;;  %v398_v10 = vpop.f32.mrb[1].mxu0  ;;  %v1541_v8 = vld [vmem:[%s2905_s9 + $0x10] sm:$0xff]  }
 0x160   :  { %v399_v11 = vadd.f32 %v398_v10, %v306_v6  ;;  %v467_v15 = vpop.f32.mrb[0].mxu1  ;;  %v1509_v6 = vld [vmem:[%s2905_s9] sm:$0xff]  }
 0x161   :  { %v472_v14 = vmax.f32 %v397_v9, 0.0  ;;  %v469_v27 = vpop.f32.mrb[1].mxu1  ;;  %v468_v53 = vadd.f32 %v467_v15, %v310_v50  ;;  %v1542_v9 = vld [vmem:[%s2905_s9 + $0x18] sm:$0xff]   ;;  %v1543_v10 = vld [vmem:[%s2905_s9 + $0x20] sm:$0xff]   ;;  %v2638_v15 = vmov 3  }
 0x162   :  { %v473_v12 = vmax.f32 %v399_v11, 0.0  ;;  %v470_v29 = vadd.f32 %v469_v27, %v314_v25  ;;  %v1544_v11 = vld [vmem:[%s2905_s9 + $0x28] sm:$0xff]   ;;  %v2466_v50 = vld [vmem:[#allocation7] ss:$16 sps:$4 sm:$0xff]  }
 0x163   :  { %v474_v54 = vmax.f32 %v468_v53, 0.0  ;;  %v2479_v25 = vld [vmem:[#allocation7 + $0x4c] ss:$16 sps:$4 sm:$0xff]   ;;  %v2481_v27 = vld [vmem:[#allocation7 + $0x48] ss:$16 sps:$4 sm:$0xff]  }
 0x164   :  { %744 = vmatprep.mubr.f32.mxu0 %v473_v12  ;;  %v475_v31 = vmax.f32 %v470_v29, 0.0  ;;  %v1545_v12 = vld [vmem:[%s2905_s9 + $0x30] sm:$0xff]   ;;  %v2487_v29 = vld [vmem:[#allocation7 + $0x68] ss:$16 sps:$4 sm:$0xff]  }
 0x165   :  { %745 = vmatmul.mubr.f32.vlgmr.msra.gmra.mrb[2].mxu0 %v472_v14  ;;  %v2634_v14 = vmov 0.0  }
 0x166   :  { %1794 = vmatpush1.bf16.msra.mxu0 %v2370_v13  ;;  %815 = vmatprep.mubr.f32.mxu0 %v475_v31  ;;  %v1546_v13 = vld [vmem:[%s2905_s9 + $0x38] sm:$0xff]  }
 0x167   :  { %1796 = vmatprep.subr.bf16.mxu0 %v2371_v16  ;;  %v1120_v16 = vld [vmem:[%s2897_s1] sm:$0x3]  ;;  %v2493_v31 = vld [vmem:[#allocation7 + $0x88] ss:$16 sps:$4 sm:$0xff]  }
 0x16a   :  { %1798 = vmatpush1.bf16.msra.mxu0 %v2373_v17  ;;  %v2635_v17 = vmov 0  }
 0x16b   :  { %1800 = vmatprep.subr.bf16.mxu0 %v2374_v18  ;;  %2219 = vset.pattern.permute.xlu0 %v2635_v17  ;;  %v2636_v18 = vmov 2  }
 0x16c   :  { %2221 = vset.pattern.permute.xlu1 %v2636_v18  ;;  %1123 = vperm.xlu0 %2219, %v1120_v16  }
 0x16d   :  { %1143 = vperm.xlu1 %2221, %v1120_v16  }
 0x16e   :  { %1802 = vmatpush1.bf16.msra.mxu0 %v2376_v19  ;;  %v2464_v19 = vld [vmem:[#allocation7 + $0x4] ss:$16 sps:$4 sm:$0xff]  }
 0x16f   :  { %1804 = vmatprep.subr.bf16.mxu0 %v2377_v20  ;;  %v2467_v20 = vld [vmem:[#allocation7 + $0xc] ss:$16 sps:$4 sm:$0xff]  }
 0x171   :  { %2222 = vset.pattern.permute.xlu1 %v2638_v15 }
 0x172   :  { %1806 = vmatpush1.bf16.msra.mxu0 %v2379_v21  ;;  %v2469_v21 = vld [vmem:[#allocation7 + $0x8] ss:$16 sps:$4 sm:$0xff]   ;;  %1153 = vperm.xlu1 %2222, %v1120_v16  }
 0x173   :  { %1808 = vmatprep.subr.bf16.mxu0 %v2380_v23  ;;  %v2473_v23 = vld [vmem:[#allocation7 + $0x2c] ss:$16 sps:$4 sm:$0xff]  }
 0x176   :  { %1810 = vmatpush1.bf16.msra.mxu0 %v2382_v24  ;;  %v2475_v24 = vld [vmem:[#allocation7 + $0x28] ss:$16 sps:$4 sm:$0xff]  }
 0x177   :  { %1812 = vmatprep.subr.bf16.mxu0 %v2383_v26  ;;  %v2637_v26 = vmov 1  }
 0x178   :  { %2220 = vset.pattern.permute.xlu0 %v2637_v26 }
 0x179   :  { %1133 = vperm.xlu0 %2220, %v1120_v16  }
 0x17a   :  { %1814 = vmatpush1.bf16.msra.mxu0 %v2385_v28  ;;  %v2485_v28 = vld [vmem:[#allocation7 + $0x6c] ss:$16 sps:$4 sm:$0xff]  }
 0x17b   :  { %1816 = vmatprep.subr.bf16.mxu0 %v2386_v30  ;;  %v2491_v30 = vld [vmem:[#allocation7 + $0x8c] ss:$16 sps:$4 sm:$0xff]  }
 0x17d   :  { %2223 = vset.pattern.permute.xlu0 %v2638_v15 }
 0x17e   :  { %1818 = vmatpush1.bf16.msra.mxu0 %v2388_v32  ;;  %v920_v32 = vld [vmem:[%s2904_s8] sm:$0x3] }
 0x17f   :  { %1820 = vmatprep.subr.bf16.mxu0 %v2389_v33  ;;  %v925_v33 = vrot.slane %v920_v32, %v2799_v0 }
 0x182   :  { %1822 = vmatpush1.bf16.msra.mxu0 %v2391_v34  ;;  %v929_v34 = vrot.slane %v920_v32, %v2807_v2 }
 0x183   :  { %1824 = vmatprep.subr.bf16.mxu0 %v2392_v35 }
 0x186   :  { %1826 = vmatpush1.bf16.msra.mxu0 %v2394_v36 }
 0x187   :  { %1828 = vmatprep.subr.bf16.mxu0 %v2395_v37 }
 0x18a   :  { %1830 = vmatpush1.bf16.msra.mxu0 %v2397_v38 }
 0x18b   :  { %1832 = vmatprep.subr.bf16.mxu0 %v2398_v39 }
 0x18e   :  { %1834 = vmatpush1.bf16.msra.mxu0 %v2400_v40 }
 0x18f   :  { %1836 = vmatprep.subr.bf16.mxu0 %v2401_v41 }
 0x192   :  { %1838 = vmatpush1.bf16.msra.mxu0 %v2403_v42  ;;  %v2639_v42 = vmov 1983009808  }
 0x193   :  { %1840 = vmatprep.subr.bf16.mxu0 %v2404_v43  ;;  %v1454_v43 = vunpack.c.l.s4 %v2639_v42 }
 0x196   :  { %1842 = vmatpush1.bf16.msra.mxu0 %v2406_v44  ;;  %v1455_v44 = vunpack.c.0.s8 %v1454_v43 }
 0x197   :  { %1844 = vmatprep.subr.bf16.mxu0 %v2407_v45  ;;  %v1006_v45 = vld [vmem:[%s2898_s2] sm:$0x3] }
 0x19a   :  { %1846 = vmatpush1.bf16.msra.mxu0 %v2409_v46 }
 0x19b   :  { %1848 = vmatprep.subr.bf16.mxu0 %v2410_v48 }
 0x19e   :  { %1850 = vmatpush1.bf16.msra.mxu0 %v2412_v49  ;;  %v2866_v49 = vsub.s32 %v1455_v44, %v2796_v61  ;;  %v2478_v61 = vld [vmem:[#allocation7 + $0x40] ss:$16 sps:$4 sm:$0xff]  }
 0x19f   :  { %1852 = vmatprep.subr.bf16.mxu0 %v2413_v51 }
 0x1a2   :  { %1854 = vmatpush1.bf16.msra.mxu0 %v2415_v52  ;;  %v2470_v52 = vld [vmem:[#allocation7 + $0x24] ss:$16 sps:$4 sm:$0xff]  }
 0x1a3   :  { %1976 = vmatprep.subr.bf16.mxu0 %v2467_v20  ;;  %v1503_v20 = vld [vmem:[%s2907_s11] ss:$0 sm:$0xff] }
 0x1a5   :  { %816 = vmatmul.mubr.f32.vlgmr.msra.gmra.mrb[2].mxu0 %v474_v54 }
 0x1a6   :  { %1416 = vmatprep.mubr.f32.mxu0 %v2634_v14  ;;  %1978 = vmatpush1.bf16.msra.mxu0 %v2469_v21 }
 0x1a7   :  { %1980 = vmatprep.subr.bf16.mxu0 %v2473_v23 }
 0x1aa   :  { %1982 = vmatpush1.bf16.msra.mxu0 %v2475_v24 }
 0x1ab   :  { %1984 = vmatprep.subr.bf16.mxu0 %v2479_v25 }
 0x1ae   :  { %1986 = vmatpush1.bf16.msra.mxu0 %v2481_v27 }
 0x1af   :  { %1988 = vmatprep.subr.bf16.mxu0 %v2485_v28 }
 0x1b2   :  { %1990 = vmatpush1.bf16.msra.mxu0 %v2487_v29 }
 0x1b3   :  { %1992 = vmatprep.subr.bf16.mxu0 %v2491_v30 }
 0x1b6   :  { %1994 = vmatpush1.bf16.msra.mxu0 %v2493_v31 }
 0x1ec   :  { %v1144_v18 = vpop.permute.xlu1 %1143 }
 0x1f1   :  { %v1154_v29 = vpop.permute.xlu1 %1153 }
 0x278   :  { %v817_v62 = vpop.f32.mrb[2].mxu0 }
 0x279   :  { %v2007_v63 = vadd.f32 %v817_v62, %v673_v59  ;;  %v819_v1 = vpop.f32.mrb[3].mxu0  ;;  %v2484_v59 = vld [vmem:[#allocation7 + $0x60] ss:$16 sps:$4 sm:$0xff]  }
 0x27a   :  { %v2008_v3 = vadd.f32 %v819_v1, %v677_v60  ;;  %v2488_v60 = vld [vmem:[#allocation7 + $0x84] ss:$16 sps:$4 sm:$0xff]   ;;  %v2490_v62 = vld [vmem:[#allocation7 + $0x80] ss:$16 sps:$4 sm:$0xff]   ;;  %v2497_v1 = vld [vmem:[#allocation7 + $0xac] ss:$16 sps:$4 sm:$0xff]  }
 0x27b   :  { %v822_v5 = vmax.f32 %v2007_v63, 0.0  ;;  %v2494_v63 = vld [vmem:[#allocation7 + $0xa4] ss:$16 sps:$4 sm:$0xff]   ;;  %1996 = vmatprep.subr.bf16.mxu0 %v2497_v1 }
 0x27c   :  { %v823_v4 = vmax.f32 %v2008_v3, 0.0  ;;  %v2496_v3 = vld [vmem:[#allocation7 + $0xa0] ss:$16 sps:$4 sm:$0xff]  }
 0x27e   :  { %996 = vmatprep.mubr.f32.mxu1 %v823_v4  ;;  %v2499_v4 = vld [vmem:[#allocation7 + $0xa8] ss:$16 sps:$4 sm:$0xff]  }
 0x27f   :  { %997 = vmatmul.mubr.f32.vlgmr.msra.gmra.mrb[2].mxu1 %v822_v5  ;;  %1998 = vmatpush1.bf16.msra.mxu0 %v2499_v4  ;;  %v2500_v5 = vld [vmem:[#allocation7 + $0xc4] ss:$16 sps:$4 sm:$0xff]  }
 0x280   :  { %1921 = vmatpush3.bf16.msra.mxu1 %v1509_v6  ;;  %1596 = vmatprep.mubr.msk.f32.mxu1 %vm2633_vm0, %v2634_v14  ;;  %v2503_v6 = vld [vmem:[#allocation7 + $0xcc] ss:$16 sps:$4 sm:$0xff]  }
 0x281   :  { %1922 = vmatprep.subr.bf16.mxu1 %v2632_v57  ;;  %2000 = vmatprep.subr.bf16.mxu0 %v2503_v6 }
 0x284   :  { %1924 = vmatpush3.bf16.msra.mxu1 %v1540_v7  ;;  %v2502_v7 = vld [vmem:[#allocation7 + $0xc0] ss:$16 sps:$4 sm:$0xff]  }
 0x285   :  { %1925 = vmatprep.subr.bf16.mxu1 %v2632_v57 }
 0x288   :  { %1927 = vmatpush3.bf16.msra.mxu1 %v1541_v8  ;;  %v2505_v8 = vld [vmem:[#allocation7 + $0xc8] ss:$16 sps:$4 sm:$0xff]  }
 0x289   :  { %1928 = vmatprep.subr.bf16.mxu1 %v2632_v57  ;;  %2002 = vmatpush1.bf16.msra.mxu0 %v2505_v8 }
 0x28c   :  { %1930 = vmatpush3.bf16.msra.mxu1 %v1542_v9  ;;  %v2506_v9 = vld [vmem:[#allocation7 + $0xe4] ss:$16 sps:$4 sm:$0xff]  }
 0x28d   :  { %1931 = vmatprep.subr.bf16.mxu1 %v2632_v57 }
 0x290   :  { %1933 = vmatpush3.bf16.msra.mxu1 %v1543_v10  ;;  %v2509_v10 = vld [vmem:[#allocation7 + $0xec] ss:$16 sps:$4 sm:$0xff]  }
 0x291   :  { %1934 = vmatprep.subr.bf16.mxu1 %v2632_v57  ;;  %2004 = vmatprep.subr.bf16.mxu0 %v2509_v10 }
 0x294   :  { %1936 = vmatpush3.bf16.msra.mxu1 %v1544_v11  ;;  %v2508_v11 = vld [vmem:[#allocation7 + $0xe0] ss:$16 sps:$4 sm:$0xff]  }
 0x295   :  { %1937 = vmatprep.subr.bf16.mxu1 %v2632_v57 }
 0x298   :  { %1939 = vmatpush3.bf16.msra.mxu1 %v1545_v12  ;;  %v2511_v12 = vld [vmem:[#allocation7 + $0xe8] ss:$16 sps:$4 sm:$0xff]  }
 0x299   :  { %1940 = vmatprep.subr.bf16.mxu1 %v2632_v57  ;;  %v2476_v57 = vld [vmem:[#allocation7 + $0x44] ss:$16 sps:$4 sm:$0xff]   ;;  %2006 = vmatpush1.bf16.msra.mxu0 %v2511_v12 }
 0x29c   :  { %1942 = vmatpush3.bf16.msra.mxu1 %v1546_v13  ;;  %v1118_v13 = vld [vmem:[%s2906_s10] sm:$0x3] }
 0x29d   :  { %1944 = vmatprep.subr.bf16.mxu1 %v2464_v19  ;;  %v1119_v16 = vunpack.c.l.bf16 %v1118_v13 }
 0x29f   :  { %v1129_v17 = vrot.slane %v1119_v16, %v2799_v0  ;;  %v1139_v19 = vrot.slane %v1119_v16, %v2807_v2  ;;  %v1149_v26 = vrot.slane %v1119_v16, %v2819_v47  ;;  %v1159_v28 = vrot.slane %v1119_v16, %v2814_v22 }
 0x2a1   :  { %v1150_v31 = vmul.f32 %v1149_v26, %v1144_v18 }
 0x352   :  { %v998_v35 = vpop.f32.mrb[2].mxu1 }
 0x353   :  { %v999_v36 = vadd.f32 %v998_v35, %v925_v33  ;;  %v1000_v37 = vpop.f32.mrb[3].mxu1  ;;  %v1160_v33 = vmul.f32 %v1159_v28, %v1154_v29 }
 0x354   :  { %v1001_v38 = vadd.f32 %v1000_v37, %v929_v34  ;;  %v1259_v37 = vld [vmem:[%s2909_s13] sm:$0xf] }
 0x356   :  { %v1003_v39 = vmul.f32 0.5, %v1001_v38  ;;  %v1473_v40 = vcombine.low %v999_v36, %v1001_v38  ;;  %v1264_v38 = vrot.slane %v1259_v37, %v2799_v0 }
 0x358   :  { %v1004_v41 = vmul.f32 1.442695, %v1003_v39  ;;  %v1480_v53 = vrot.slane %v1473_v40, %v2866_v49  ;;  %v1272_v39 = vrot.slane %v1259_v37, %v2819_v47  ;;  %v1268_v40 = vrot.slane %v1259_v37, %v2807_v2 }
 0x35a   :  { %2512 = vpow2.f32 %v1004_v41  ;;  %v1276_v41 = vrot.slane %v1259_v37, %v2814_v22 }
 0x364   :  { %v2513_v46 = vpop.eup %2512 }
 0x365   :  { %v1007_v48 = vmul.f32 %v2513_v46, %v1006_v45 }
 0x367   :  { %v1008_v51 = vadd.f32 %v1007_v48, %v999_v36 }
 0x369   :  { %v1487_v54 = vrot.slane %v1008_v51, %v2866_v49  ;;  %1597 = vmatmul.mubr.f32.vlgmr.msra.gmra.mrb[4].mxu1 %v1008_v51 }
 0x36a   :  { %1946 = vmatpush1.bf16.msra.mxu1 %v2466_v50  ;;  %1345 = vmatprep.mubr.f32.mxu1 %v2634_v14  ;;  %v1124_v14 = vpop.permute.xlu0 %1123 }
 0x36b   :  { %v1488_v56 = vcombine.low %v1480_v53, %v1487_v54  ;;  %1948 = vmatprep.subr.bf16.mxu1 %v2470_v52  ;;  %v1130_v23 = vmul.f32 %v1129_v17, %v1124_v14 }
 0x36d   :  { %1490 = vst [vmem:[%s2911_s15] sm:$0x3f] %v1488_v56 }
 0x36e   :  { %1950 = vmatpush1.bf16.msra.mxu1 %v2472_v55  ;;  %v1134_v21 = vpop.permute.xlu0 %1133 }
 0x36f   :  { %1952 = vmatprep.subr.bf16.mxu1 %v2476_v57  ;;  %v1140_v27 = vmul.f32 %v1139_v19, %v1134_v21 }
 0x372   :  { %1954 = vmatpush1.bf16.msra.mxu1 %v2478_v61 }
 0x373   :  { %1956 = vmatprep.subr.bf16.mxu1 %v2482_v58 }
 0x376   :  { %1958 = vmatpush1.bf16.msra.mxu1 %v2484_v59 }
 0x377   :  { %1960 = vmatprep.subr.bf16.mxu1 %v2488_v60 }
 0x37a   :  { %1962 = vmatpush1.bf16.msra.mxu1 %v2490_v62 }
 0x37b   :  { %1964 = vmatprep.subr.bf16.mxu1 %v2494_v63 }
 0x37e   :  { %1966 = vmatpush1.bf16.msra.mxu1 %v2496_v3 }
 0x37f   :  { %1968 = vmatprep.subr.bf16.mxu1 %v2500_v5 }
 0x382   :  { %1970 = vmatpush1.bf16.msra.mxu1 %v2502_v7 }
 0x383   :  { %1972 = vmatprep.subr.bf16.mxu1 %v2506_v9 }
 0x386   :  { %1974 = vmatpush1.bf16.msra.mxu1 %v2508_v11 }
 0x43c   :  { %v1114_v24 = vpop.f32.mrb[4].mxu1 }
 0x43d   :  { %v1115_v25 = vadd.f32 %v1503_v20, %v1114_v24  ;;  %v1598_v15 = vpop.f32.mrb[5].mxu1 }
 0x43f   :  { %v1131_v30 = vadd.f32 %v1130_v23, %v1115_v25 }
 0x441   :  { %v1141_v32 = vadd.f32 %v1140_v27, %v1131_v30 }
 0x443   :  { %v1151_v34 = vadd.f32 %v1150_v31, %v1141_v32 }
 0x445   :  { %v1161_v35 = vadd.f32 %v1160_v33, %v1151_v34 }
 0x447   :  { %v1162_v36 = vmax.f32 %v1161_v35, 0.0 }
 0x449   :  { %1346 = vmatmul.mubr.f32.vlgmr.msra.gmra.mrb[6].mxu1 %v1162_v36  ;;  %1417 = vmatmul.mubr.f32.vlgmr.msra.gmra.mrb[4].mxu0 %v1162_v36 }
 0x51c   :  { %v1347_v42 = vpop.f32.mrb[6].mxu1  ;;  %v1418_v43 = vpop.f32.mrb[4].mxu0 }
 0x51d   :  { %v1348_v44 = vadd.f32 %v1347_v42, %v1264_v38  ;;  %v1419_v45 = vadd.f32 %v1418_v43, %v1272_v39  ;;  %v1349_v46 = vpop.f32.mrb[7].mxu1  ;;  %v1420_v48 = vpop.f32.mrb[5].mxu0 }
 0x51e   :  { %v1350_v50 = vadd.f32 %v1349_v46, %v1268_v40  ;;  %v1421_v51 = vadd.f32 %v1420_v48, %v1276_v41 }
 0x51f   :  { %v1504_v52 = vmul.f32 -1.442695, %v1348_v44  ;;  %v1506_v53 = vmul.f32 -1.442695, %v1419_v45 }
 0x520   :  { %v1505_v54 = vmul.f32 -1.442695, %v1350_v50  ;;  %v1507_v55 = vmul.f32 -1.442695, %v1421_v51 }
 0x521   :  { %2514 = vpow2.f32 %v1504_v52 }
 0x522   :  { %2516 = vpow2.f32 %v1506_v53 }
 0x523   :  { %2518 = vpow2.f32 %v1505_v54 }
 0x524   :  { %2520 = vpow2.f32 %v1507_v55 }
 0x52b   :  { %v2515_v0 = vpop.eup %2514 }
 0x52c   :  { %v2517_v2 = vpop.eup %2516  ;;  %v1435_v47 = vadd.f32 1.0, %v2515_v0 }
 0x52d   :  { %v2519_v22 = vpop.eup %2518  ;;  %v1437_v56 = vadd.f32 1.0, %v2517_v2 }
 0x52e   :  { %v2521_v57 = vpop.eup %2520  ;;  %2522 = vrcp.f32 %v1435_v47  ;;  %v1436_v61 = vadd.f32 1.0, %v2519_v22 }
 0x52f   :  { %2524 = vrcp.f32 %v1437_v56  ;;  %v1438_v58 = vadd.f32 1.0, %v2521_v57 }
 0x530   :  { %2526 = vrcp.f32 %v1436_v61 }
 0x531   :  { %2528 = vrcp.f32 %v1438_v58 }
 0x538   :  { %v2523_v59 = vpop.eup %2522 }
 0x539   :  { %v2525_v60 = vpop.eup %2524 }
 0x53a   :  { %v2527_v62 = vpop.eup %2526 }
 0x53b   :  { %v2529_v63 = vpop.eup %2528  ;;  %v1451_v1 = vcombine.low %v2523_v59, %v2527_v62 }
 0x53c   :  { %v1452_v3 = vcombine.low %v2525_v60, %v2529_v63 }
 0x53d   :  { %v1459_v4 = vrot.slane %v1451_v1, %v2866_v49 }
 0x53e   :  { %v1466_v5 = vrot.slane %v1452_v3, %v2866_v49 }
 0x540   :  { %v1467_v6 = vcombine.low %v1459_v4, %v1466_v5 }
 0x542   :  { %1469 = vst [vmem:[%s2910_s14] sm:$0xff] %v1467_v6 }
 0x543   :  { %1499 = vsyncpa [#allocation3], 1 }
 0x544   :  { %1500 = vsyncpa [#allocation5], 1 }
 0x545   :  { %1501 = vsyncpa [#allocation8], 1 }

</bundles_post_ra>
